<compile_context>
chip_gen: v6e
topology: v6e:2x2x1
jax: 0.10.0
libtpu: 0.0.40
codegen_flags: <defaults>
</compile_context>

<pallas_src>
import functools

import numpy as np

import jax
import jax.numpy as jnp
from jax.experimental import pallas as pl
from jax.experimental.pallas import tpu as pltpu


def _round_up(x, m):
    return ((x + m - 1) // m) * m


def _largest_divisor_tile(padded, granularity, cap):
    """Largest multiple of `granularity` that divides `padded` and is <= cap."""
    units = padded // granularity
    best = granularity
    for d in range(1, units + 1):
        if units % d == 0:
            t = d * granularity
            if t <= cap:
                best = t
    return best


# ----------------------------------------------------------------------------
# Kernels
# ----------------------------------------------------------------------------
def _linear_kernel_single_k(x_ref, w_ref, b_ref, o_ref, *, cast_dtype):
    """K fits in one tile: write dot + bias directly, no accumulator scratch."""
    x = x_ref[...]
    w = w_ref[...]
    if cast_dtype is not None:
        x = x.astype(cast_dtype)
        w = w.astype(cast_dtype)
    acc = jnp.dot(x, w, preferred_element_type=jnp.float32)
    o_ref[...] = (acc + b_ref[...].astype(jnp.float32)).astype(o_ref.dtype)


def _linear_kernel_multi_k(x_ref, w_ref, b_ref, o_ref, acc_ref, *, cast_dtype):
    """One (tm, tn) output tile; K is the innermost ('arbitrary') grid axis."""
    k = pl.program_id(2)

    @pl.when(k == 0)
    def _init():
        acc_ref[...] = jnp.zeros_like(acc_ref)

    x = x_ref[...]
    w = w_ref[...]
    if cast_dtype is not None:
        x = x.astype(cast_dtype)
        w = w.astype(cast_dtype)
    acc_ref[...] += jnp.dot(x, w, preferred_element_type=jnp.float32)

    @pl.when(k == pl.num_programs(2) - 1)
    def _finalize():
        # Bias add only in the epilogue: O(M*N) work, not O(M*N*K/tk).
        o_ref[...] = (acc_ref[...] + b_ref[...].astype(jnp.float32)).astype(
            o_ref.dtype
        )


# ----------------------------------------------------------------------------
# Wrapper
# ----------------------------------------------------------------------------
def pallas_linear(
    x,
    w,
    b,
    *,
    max_tm=512,
    max_tn=512,
    max_tk=1024,
    cast_dtype=None,            # e.g. jnp.bfloat16 for native-MXU throughput
    split_for_megacore=True,    # keep >=2 parallel tiles for v7x's 2 TCs
):
    """y = x @ w + b via a tiled, double-buffered Pallas matmul."""
    batch, in_f = x.shape
    in_f_w, out_f = w.shape
    assert in_f == in_f_w, (in_f, in_f_w)
    assert b.shape == (out_f,)

    # Pad only to hardware granularity (sublane=8 on M, lane=128 on K/N).
    m_pad = _round_up(batch, 8)
    k_pad = _round_up(in_f, 128)
    n_pad = _round_up(out_f, 128)

    # Tiles are divisors of the padded dims -> no per-tile over-padding.
    tm = _largest_divisor_tile(m_pad, 8, max_tm)
    tn = _largest_divisor_tile(n_pad, 128, max_tn)
    tk = _largest_divisor_tile(k_pad, 128, max_tk)

    # v7x megacore: the "parallel" grid axes shard across 2 TensorCores; make
    # sure there are at least 2 parallel tiles when the problem allows it.
    if split_for_megacore and (m_pad // tm) * (n_pad // tn) < 2:
        if m_pad // 8 >= 2:
            tm = _largest_divisor_tile(m_pad, 8, max(8, tm // 2))
        elif n_pad // 128 >= 2:
            tn = _largest_divisor_tile(n_pad, 128, max(128, tn // 2))

    # Zero-pad only when actually needed (jnp.pad is a full HBM rewrite).
    if m_pad == batch and k_pad == in_f:
        x_p = x
    else:
        x_p = jnp.pad(x, ((0, m_pad - batch), (0, k_pad - in_f)))
    if k_pad == in_f and n_pad == out_f:
        w_p = w
    else:
        w_p = jnp.pad(w, ((0, k_pad - in_f), (0, n_pad - out_f)))
    b2 = b if n_pad == out_f else jnp.pad(b, (0, n_pad - out_f))
    b_p = b2.reshape(1, n_pad)

    m_grid = m_pad // tm
    n_grid = n_pad // tn
    k_grid = k_pad // tk

    if k_grid == 1:
        # Single-K kernel: no accumulator scratch, no epilogue copy.
        kernel = functools.partial(_linear_kernel_single_k, cast_dtype=cast_dtype)
        grid_spec = pltpu.PrefetchScalarGridSpec(
            num_scalar_prefetch=0,
            grid=(m_grid, n_grid),
            in_specs=[
                pl.BlockSpec((tm, tk), lambda i, j: (i, 0)),
                pl.BlockSpec((tk, tn), lambda i, j: (0, j)),
                pl.BlockSpec((1, tn), lambda i, j: (0, j)),
            ],
            out_specs=pl.BlockSpec((tm, tn), lambda i, j: (i, j)),
        )
        dim_sem = ("parallel", "parallel")
    else:
        kernel = functools.partial(_linear_kernel_multi_k, cast_dtype=cast_dtype)
        grid_spec = pltpu.PrefetchScalarGridSpec(
            num_scalar_prefetch=0,
            grid=(m_grid, n_grid, k_grid),
            in_specs=[
                pl.BlockSpec((tm, tk), lambda i, j, k: (i, k)),
                pl.BlockSpec((tk, tn), lambda i, j, k: (k, j)),
                pl.BlockSpec((1, tn), lambda i, j, k: (0, j)),
            ],
            out_specs=pl.BlockSpec((tm, tn), lambda i, j, k: (i, j)),
            scratch_shapes=[pltpu.VMEM((tm, tn), jnp.float32)],
        )
        dim_sem = ("parallel", "parallel", "arbitrary")

    out_p = pl.pallas_call(
        kernel,
        out_shape=jax.ShapeDtypeStruct((m_pad, n_pad), x.dtype),
        grid_spec=grid_spec,
        compiler_params=pltpu.CompilerParams(
            dimension_semantics=dim_sem,
            # Max working set (tm=tn=512, tk=1024, f32, double-buffered) is
            # ~19 MiB -> fits the 32 MiB scoped limit on v5e/v6e/v7x alike.
            vmem_limit_bytes=32 * 1024 * 1024,
        ),
    )(x_p, w_p, b_p)

    if m_pad == batch and n_pad == out_f:
        return out_p
    return out_p[:batch, :out_f]


def module_forward(x, w, b, *, force_pallas=False, cast_dtype=None):
    """Pallas equivalent of Module.forward where net = Linear(in_f, out_f)."""
    batch, in_f = x.shape
    out_f = w.shape[1]
    # Below ~8M MACs the kernel launch + DMA overhead dominates; XLA's fused
    # dot wins there.
    if not force_pallas and batch * in_f * out_f < (1 << 23):
        y = jnp.dot(x, w, preferred_element_type=jnp.float32) + b
        return y.astype(x.dtype)
    return pallas_linear(x, w, b, cast_dtype=cast_dtype)


# TODO(synk): Module.plot / training_step / ProgressBoard are host-side
# bookkeeping (matplotlib, trainer state) with no Pallas equivalent.

if __name__ == "__main__":
    key = jax.random.PRNGKey(0)
    k_x, k_w, k_b, k_x2, k_w2, k_b2, k_x3, k_w3, k_b3 = jax.random.split(key, 9)

    # --- Case 1: tiny d2l-style shapes -> fast path (plain jnp.dot) --------
    batch, in_f, out_f = 8, 32, 8
    x = jax.random.normal(k_x, (batch, in_f), dtype=jnp.float32)
    w = jax.random.normal(k_w, (in_f, out_f), dtype=jnp.float32) * 0.02
    b = jax.random.normal(k_b, (out_f,), dtype=jnp.float32) * 0.02

    y = module_forward(x, w, b)
    jax.block_until_ready(y)
    assert y.shape == (batch, out_f)
    assert jnp.allclose(y, x @ w + b, atol=1e-4, rtol=1e-4)

    # --- Case 2: moderate shapes, single-K Pallas kernel --------------------
    # in_f=384 -> tk=384 (K grid collapses); out_f=200 -> n_pad=256, tn=256;
    # x needs no padding at all (512x384 already aligned).
    batch2, in_f2, out_f2 = 512, 384, 200
    x2 = jax.random.normal(k_x2, (batch2, in_f2), dtype=jnp.float32)
    w2 = jax.random.normal(k_w2, (in_f2, out_f2), dtype=jnp.float32) * 0.05
    b2 = jax.random.normal(k_b2, (out_f2,), dtype=jnp.float32) * 0.05

    y2 = module_forward(x2, w2, b2, force_pallas=True)
    jax.block_until_ready(y2)
    assert y2.shape == (batch2, out_f2)

    y2_ref = (
        np.asarray(x2, np.float64) @ np.asarray(w2, np.float64)
        + np.asarray(b2, np.float64)
    )
    max_err = float(np.max(np.abs(np.asarray(y2, np.float64) - y2_ref)))
    assert max_err < 2e-2, f"case 2 max abs error too large: {max_err}"

    # Same case with bf16 matmul operands (f32 accumulate + bias): looser tol.
    y2b = module_forward(x2, w2, b2, force_pallas=True, cast_dtype=jnp.bfloat16)
    jax.block_until_ready(y2b)
    max_err_b = float(np.max(np.abs(np.asarray(y2b, np.float64) - y2_ref)))
    assert max_err_b < 1e-1, f"case 2 (bf16) max abs error too large: {max_err_b}"

    # --- Case 3: K > max_tk exercises the multi-K accumulator kernel --------
    # k_pad=1280 -> tk=640, k_grid=2; megacore split gives grid (2, 1, 2).
    batch3, in_f3, out_f3 = 128, 1280, 256
    x3 = jax.random.normal(k_x3, (batch3, in_f3), dtype=jnp.float32)
    w3 = jax.random.normal(k_w3, (in_f3, out_f3), dtype=jnp.float32) * 0.02
    b3 = jax.random.normal(k_b3, (out_f3,), dtype=jnp.float32) * 0.02

    y3 = module_forward(x3, w3, b3, force_pallas=True)
    jax.block_until_ready(y3)
    assert y3.shape == (batch3, out_f3)

    y3_ref = (
        np.asarray(x3, np.float64) @ np.asarray(w3, np.float64)
        + np.asarray(b3, np.float64)
    )
    max_err3 = float(np.max(np.abs(np.asarray(y3, np.float64) - y3_ref)))
    assert max_err3 < 2e-2, f"case 3 max abs error too large: {max_err3}"

    print("KERNEL_OK")
</pallas_src>

<mosaic_0001>
module attributes {stable_mosaic.version = 11 : i64} {
  func.func @_linear_kernel_single_k(%arg0: i32, %arg1: i32, %arg2: memref<256x384xf32, #tpu.memory_space<vmem>>, %arg3: memref<384x256xf32, #tpu.memory_space<vmem>>, %arg4: memref<1x256xf32, #tpu.memory_space<vmem>>, %arg5: memref<256x256xf32, #tpu.memory_space<vmem>>) attributes {dimension_semantics = [#tpu.dimension_semantics<parallel>, #tpu.dimension_semantics<parallel>], iteration_bounds = array<i64: 2, 1>, scalar_prefetch = 0 : i64, scratch_operands = 0 : i64, tpu.core_type = #tpu.core_type<tc>, window_params = [{transform_indices = @transform_0, window_bounds = array<i64: 256, 384>}, {transform_indices = @transform_1, window_bounds = array<i64: 384, 256>}, {transform_indices = @transform_2, window_bounds = array<i64: 1, 256>}, {transform_indices = @transform_3, window_bounds = array<i64: 256, 256>}]} {
    %c0 = arith.constant 0 : index
    %c0_0 = arith.constant 0 : index
    %0 = vector.load %arg2[%c0, %c0_0] : memref<256x384xf32, #tpu.memory_space<vmem>>, vector<256x384xf32>
    %c0_1 = arith.constant 0 : index
    %c0_2 = arith.constant 0 : index
    %1 = vector.load %arg3[%c0_1, %c0_2] : memref<384x256xf32, #tpu.memory_space<vmem>>, vector<384x256xf32>
    %cst = arith.constant dense<0.000000e+00> : vector<256x256xf32>
    %2 = tpu.matmul %0, %1, %cst {dimension_numbers = #tpu.dot_dimension_numbers<[1], [0], [0], [1], [0, 0, 1, 1], [], []>} : vector<256x384xf32>, vector<384x256xf32>, vector<256x256xf32> -> vector<256x256xf32>
    %c0_3 = arith.constant 0 : index
    %c0_4 = arith.constant 0 : index
    %3 = vector.load %arg4[%c0_3, %c0_4] : memref<1x256xf32, #tpu.memory_space<vmem>>, vector<1x256xf32>
    %4 = vector.broadcast %3 : vector<1x256xf32> to vector<256x256xf32>
    %5 = arith.addf %2, %4 : vector<256x256xf32>
    %c0_5 = arith.constant 0 : index
    %c0_6 = arith.constant 0 : index
    %6 = vector.load %arg5[%c0_5, %c0_6] : memref<256x256xf32, #tpu.memory_space<vmem>>, vector<256x256xf32>
    tpu.vector_store %arg5[%c0_5, %c0_6], %5 {strides = array<i32>} : memref<256x256xf32, #tpu.memory_space<vmem>>, vector<256x256xf32>,
    return
  }
  func.func @transform_0(%arg0: i32, %arg1: i32) -> (i32, i32) {
    %c0_i32 = arith.constant 0 : i32
    %c0_i32_0 = arith.constant 0 : i32
    return %arg0, %c0_i32 : i32, i32
  }
  func.func @transform_1(%arg0: i32, %arg1: i32) -> (i32, i32) {
    %c0_i32 = arith.constant 0 : i32
    %c0_i32_0 = arith.constant 0 : i32
    return %c0_i32, %arg1 : i32, i32
  }
  func.func @transform_2(%arg0: i32, %arg1: i32) -> (i32, i32) {
    %c0_i32 = arith.constant 0 : i32
    %c0_i32_0 = arith.constant 0 : i32
    return %c0_i32, %arg1 : i32, i32
  }
  func.func @transform_3(%arg0: i32, %arg1: i32) -> (i32, i32) {
    %c0_i32 = arith.constant 0 : i32
    return %arg0, %arg1 : i32, i32
  }
}

</mosaic_0001>

<bundles_post_ra>
// kernel: tpu_custom_call.1
= control target key start
LH: loop header
LB: loop body
LE: loop exit
PB: predicated region body
PF: predicated region fallthrough
CT: control target
= control target key end

     0   :  { %8 = vsyncpa [#allocation3], 0  ;;  %s1874_s0 = inlined_call_operand.hbm [shape: f32[512,384], index: 0, kind: input, shape index: {}]   ;;  %s1875_s1 = inlined_call_operand.hbm [shape: f32[384,256], index: 1, kind: input, shape index: {}]   ;;  %s1876_s2 = inlined_call_operand.vmem [shape: f32[1,256], index: 2, kind: input, shape index: {}]   ;;  %s1877_s3 = inlined_call_operand.hbm [shape: f32[512,256], index: 3, kind: output, shape index: {}]  }
   0x1   :  { %10 = vsyncpa [#allocation3 + $0x1], 0 }
   0x2   :  { %11 = vsyncpa [#allocation6], 0 }
   0x3   :  { %12 = vsyncpa [#allocation4], 0 }
   0x4   :  { %14 = vsyncpa [#allocation4 + $0x1], 0  ;;  %s1430_s12 = smov 0   ;;  %s1432_s13 = smov 0  }
   0x5   :  { %s1434_s14 = smov 0   ;;  %s1436_s15 = smov 0  }
   0x6   :  { %s1438_s16 = smov 0   ;;  %s1440_s17 = smov 0  }
   0x7 LB: > { %s1157_s18 = sadd.s32 4294967295, %s1398_s17   ;;  %s1158_s19 = sadd.s32 4294967294, %s1398_s17   ;;  %s1398_s17 = sphi %s1440_s17, %s20_s17   ;;  %s1394_s16 = sphi %s1438_s16, %s1893_s16   ;;  %s1390_s15 = sphi %s1436_s15, %s1892_s15   ;;  %s1386_s14 = sphi %s1434_s14, %s1891_s14   ;;  %s1382_s13 = sphi %s1432_s13, %s1890_s13   ;;  %s1378_s12 = sphi %s1430_s12, %s1889_s12  }
   0x8   : > { %p52_p0 = scmp.ne.s32.totalorder %s1382_s13, %s1378_s12  ;;  %p1464_p1 = scmp.eq.s32.totalorder %s1157_s18, 0 }
   0x9   : > { %p1468_p2 = scmp.eq.s32.totalorder %s1157_s18, 1  ;;  %p136_p3 = scmp.eq.s32.totalorder %s1158_s19, 1 }
   0xa   : > { %p1474_p4 = por %p1464_p1, %p52_p0  ;;  %p1159_p5 = scmp.ge.s32.totalorder %s1398_s17, 1 }
   0xb   : > { %p1479_p6 = por %p136_p3, %p52_p0  ;;  %p143_p7 = scmp.lt.s32.totalorder %s1398_s17, 3 }
   0xc   : > { %s1881_s22 = scalar_select %p1474_p4, 1, 0 }
   0xd   : > { %s1882_s23 = scalar_select %p1479_p6, 1, 0 }
   0xe   : > { %p1484_p8 = pnand %p1159_p5, %p143_p7  ;;  %s1400_s25 = smov [#allocation5]  }
   0xf   : > { %s158_s26 = sshll.u32 %s1400_s25, 4  ;;  %p1162_p10 = scmp.ge.s32.totalorder %s1398_s17, 2  ;;  %s159_s26 = int_to_ptr.vmem [resolvable:$true] %s158_s26 }
  0x10   : > { %p1188_p9 = pneg %p1484_p8  ;;  %s32_s28 = sadd.s32 1, %s1394_s16 }
  0x11   : > { %s1271_s29 = scalar_lea.vmem %s159_s26, 12288  ;;  %p1279_p5 = scmp.lt.s32.totalorder %s159_s26, %s159_s26 }
  0x12   : > { %p1493_p11 = pnand %p1188_p9, %p1464_p1  ;;  %p1272_p13 = scmp.ne.s32.totalorder %s159_s26, %s1271_s29 }
  0x13   : > { %p1280_p7 = scmp.lt.s32.totalorder %s1271_s29, %s1271_s29 }
  0x14   : > { %p1262_p12 = pneg %p1493_p11 }
  0x15   : > { %p1281_p6 = por %p1280_p7, %p1279_p5 }
  0x16   : > { %p1274_p0 = pnand %p1272_p13, %p1262_p12 }
  0x18   : > { %p1275_p3 = pneg %p1274_p0 }
  0x1a   : > { %p1282_p4 = pnand %p1281_p6, %p1275_p3 }
  0x1c   : > { %1285 = shalt.err (!%p1282_p4)
}
  0x1d   : > { %s1401_s30 = smov 256   ;;  %s1402_s4 = smov 16  }
  0x1e   : > { %1191 = dma.hbm_to_vmem [thread:$0]  (!%p1493_p11), %s1875_s1, 12288, %s159_s26, [#allocation6], %s1401_s30, %s1401_s30, %s1402_s4  }
  0x1f   : > { %p34_p6 = scmp.ge.s32.totalorder %s32_s28, 2  ;;  %s39_s7 = sadd.s32 1, %s1386_s14 }
  0x20   : > { %p46_p4 = scmp.ne.s32.totalorder %s1386_s14, %s1382_s13  ;;  %p47_p9 = scmp.eq.s32.totalorder %s1398_s17, 0 }
  0x21   : > { %s1895_s28 = smov (%p34_p6, %s32_s28), 0  ;;  %p1201_p0 = scmp.lt.s32.totalorder %s1398_s17, 2 }
  0x22   : > { %p48_p12 = por %p47_p9, %p46_p4  ;;  %p1513_p13 = por %p1468_p2, %p46_p4 }
  0x23   : > { %s36_s9 = ssub.s32 %s1394_s16, %s1895_s28  ;;  %s180_s10 = sand.u32 1, %s1386_s14  }
  0x24   : > { %p37_p3 = scmp.eq.s32.totalorder %s36_s9, 0  ;;  %s1177_s11 = smul.u32 768, %s180_s10 }
  0x25   : > { %s1178_s19 = smul.u32 12288, %s1394_s16  ;;  %p1525_p11 = pnand %p1201_p0, %p48_p12 }
  0x26   : > { %s1522_s18 = scalar_select %p37_p3, %s1386_s14, %s39_s7  }
  0x27   : > { %s184_s25 = scalar_lea.vmem [#allocation2], %s1177_s11  ;;  %s191_s30 = scalar_lea.hbm %s1874_s0, %s1178_s19 }
  0x28   : > { %s192_s26 = sshll.u32 %s184_s25, 4  ;;  %s181_s4 = scalar_lea.sflag [#allocation3], %s180_s10  ;;  %s193_s26 = int_to_ptr.vmem [resolvable:$true] %s192_s26 }
  0x29   : > { %p1288_p2 = pneg %p1525_p11  ;;  %s1299_s5 = scalar_lea.vmem %s193_s26, 12288 }
  0x2a   : > { %p1300_p5 = scmp.ne.s32.totalorder %s193_s26, %s1299_s5  ;;  %s1403_s6 = smov [#allocation2]  }
  0x2b   : > { %s1304_s7 = sshll.u32 %s1403_s6, 4  ;;  %s1305_s7 = int_to_ptr.vmem [resolvable:$false] %s1304_s7 }
  0x2c   : > { %p1302_p7 = pnand %p1300_p5, %p1288_p2  ;;  %s1306_s9 = scalar_lea.vmem %s1305_s7, 24576 }
  0x2d   : > { %p1307_p4 = scmp.lt.s32.totalorder %s193_s26, %s1305_s7  ;;  %p1308_p9 = scmp.lt.s32.totalorder %s1306_s9, %s1299_s5 }
  0x2e   : > { %p1303_p6 = pneg %p1302_p7 }
  0x2f   : > { %p1309_p12 = por %p1308_p9, %p1307_p4 }
  0x31   : > { %p1310_p0 = pnand %p1309_p12, %p1303_p6 }
  0x33   : > { %1313 = shalt.err (!%p1310_p0)
}
  0x34   : > { %s1404_s11 = smov 384   ;;  %s1405_s19 = smov 24  }
  0x35   : > { %1195 = dma.hbm_to_vmem [thread:$0]  (!%p1525_p11), %s191_s30, 12288, %s193_s26, %s181_s4, %s1404_s11, %s1404_s11, %s1405_s19  }
  0x36   : > { %204 = sbr.rel (%p1484_p8) target bundleno = 464 (0x1d0), region = 32  ;;  %s1539_s10 = sand.u32 (!%p1484_p8), 1, %s1382_s13  }
  0x37   : > { %s1179_s25 = smul.u32 (!%p1484_p8), 768, %s1539_s10  ;;  %s207_s29 = scalar_lea.sflag (!%p1484_p8), [#allocation3], %s1539_s10 }
  0x38   : > { %p1887_p3 = scmp.ne.s32.totalorder (!%p1484_p8), %s1881_s22, 0 }
  0x39   : > { %s1543_s21 = scalar_lea.vmem (!%p1484_p8), [#allocation2], %s1179_s25 }
  0x3b   : > { %1365 = dma.done.wait (%p1887_p3), %s207_s29, 12288  }
  0x3c   : > { %1367 = vsyncadd (%p1887_p3), %s207_s29, 4294955008 }
  0x3d   : > { %1369 = dma.done.wait (%p1464_p1), [#allocation6], 12288  }
  0x3e   : > { %1371 = vsyncadd (%p1464_p1), [#allocation6], 4294955008  ;;  %v1406_v0 = vmov 0.0   ;;  %v377_v1 = vld [vmem:[#allocation5 + $0xf8] sm:$0xff]  ;;  %v376_v2 = vld [vmem:[#allocation5 + $0xf0] sm:$0xff]  ;;  %s1168_s24 = sshll.u32 %s1539_s10, 9 }
  0x3f   : > { %775 = vmatprep.mubr.f32.mxu1 %v1406_v0  ;;  %v375_v3 = vld [vmem:[#allocation5 + $0xe8] sm:$0xff]  ;;  %454 = vmatprep.subr.mxu0 %v377_v1  ;;  %v374_v4 = vld [vmem:[#allocation5 + $0xe0] sm:$0xff]  ;;  %v373_v5 = vld [vmem:[#allocation5 + $0xd8] sm:$0xff]  ;;  %s1691_s26 = scalar_lea.vmem [#allocation7], %s1168_s24  ;;  %s1176_s27 = sshll.u32 %s1390_s15, 13 }
  0x40   : > { %455 = vmatpush1.msra.mxu0 %v376_v2  ;;  %v372_v6 = vld [vmem:[#allocation5 + $0xd0] sm:$0xff]  ;;  %v371_v7 = vld [vmem:[#allocation5 + $0xc8] sm:$0xff]  ;;  %v370_v8 = vld [vmem:[#allocation5 + $0xc0] sm:$0xff]  ;;  %s1049_s30 = sshll.u32 %s1691_s26, 4  ;;  %s1822_s6 = scalar_lea.hbm %s1877_s3, %s1176_s27  ;;  %s1824_s30 = int_to_ptr.vmem [resolvable:$true] %s1049_s30 }
  0x41   : > { %456 = vmatprep.subr.mxu0 %v375_v3  ;;  %v369_v9 = vld [vmem:[#allocation5 + $0xb8] sm:$0xff]  ;;  %v368_v10 = vld [vmem:[#allocation5 + $0xb0] sm:$0xff]  ;;  %v367_v11 = vld [vmem:[#allocation5 + $0xa8] sm:$0xff]  ;;  %s1033_s15 = scalar_lea.sflag [#allocation4], %s1539_s10  ;;  %s1314_s7 = scalar_lea.vmem %s1824_s30, 8192 }
  0x42   : > { %457 = vmatpush1.msra.mxu0 %v374_v4  ;;  %v366_v12 = vld [vmem:[#allocation5 + $0xa0] sm:$0xff]  ;;  %v365_v13 = vld [vmem:[#allocation5 + $0x98] sm:$0xff]  ;;  %v364_v14 = vld [vmem:[#allocation5 + $0x90] sm:$0xff]  ;;  %p1315_p1 = scmp.ne.s32.totalorder %s1824_s30, %s1314_s7  ;;  %s1407_s9 = smov [#allocation7]  }
  0x43   : > { %458 = vmatprep.subr.mxu0 %v373_v5  ;;  %v441_v15 = vld [vmem:[#allocation5 + $0x2f8] sm:$0xff]  ;;  %v440_v16 = vld [vmem:[#allocation5 + $0x2f0] sm:$0xff]  ;;  %v363_v17 = vld [vmem:[#allocation5 + $0x88] sm:$0xff]  ;;  %s1318_s11 = sshll.u32 %s1407_s9, 4  ;;  %s1319_s11 = int_to_ptr.vmem [resolvable:$false] %s1318_s11 }
  0x44   : > { %459 = vmatpush1.msra.mxu0 %v372_v6  ;;  %711 = vmatprep.subr.mxu1 %v441_v15  ;;  %v439_v18 = vld [vmem:[#allocation5 + $0x2e8] sm:$0xff]  ;;  %v362_v19 = vld [vmem:[#allocation5 + $0x80] sm:$0xff]  ;;  %v437_v21 = vld [vmem:[#allocation5 + $0x2d8] sm:$0xff]  ;;  %p1316_p8 = pnand %p1315_p1, %p1513_p13  ;;  %s1320_s19 = scalar_lea.vmem %s1319_s11, 16384 }
  0x45   : > { %460 = vmatprep.subr.mxu0 %v371_v7  ;;  %712 = vmatpush1.msra.mxu1 %v440_v16  ;;  %v438_v20 = vld [vmem:[#allocation5 + $0x2e0] sm:$0xff]  ;;  %v361_v22 = vld [vmem:[#allocation5 + $0x78] sm:$0xff]  ;;  %v436_v23 = vld [vmem:[#allocation5 + $0x2d0] sm:$0xff]  ;;  %p1321_p2 = scmp.lt.s32.totalorder %s1824_s30, %s1319_s11  ;;  %p1322_p5 = scmp.lt.s32.totalorder %s1320_s19, %s1314_s7 }
  0x46   : > { %461 = vmatpush1.msra.mxu0 %v370_v8  ;;  %713 = vmatprep.subr.mxu1 %v439_v18  ;;  %v360_v24 = vld [vmem:[#allocation5 + $0x70] sm:$0xff]  ;;  %v435_v25 = vld [vmem:[#allocation5 + $0x2c8] sm:$0xff]  ;;  %v434_v27 = vld [vmem:[#allocation5 + $0x2c0] sm:$0xff]  ;;  %p1317_p11 = pneg %p1316_p8 }
  0x47   : > { %462 = vmatprep.subr.mxu0 %v369_v9  ;;  %714 = vmatpush1.msra.mxu1 %v438_v20  ;;  %v359_v26 = vld [vmem:[#allocation5 + $0x68] sm:$0xff]  ;;  %v358_v28 = vld [vmem:[#allocation5 + $0x60] sm:$0xff]  ;;  %v433_v29 = vld [vmem:[#allocation5 + $0x2b8] sm:$0xff]  ;;  %p1323_p7 = por %p1322_p5, %p1321_p2 }
  0x48   : > { %463 = vmatpush1.msra.mxu0 %v368_v10  ;;  %715 = vmatprep.subr.mxu1 %v437_v21  ;;  %v357_v30 = vld [vmem:[#allocation5 + $0x58] sm:$0xff]  ;;  %v432_v31 = vld [vmem:[#allocation5 + $0x2b0] sm:$0xff]  ;;  %v431_v33 = vld [vmem:[#allocation5 + $0x2a8] sm:$0xff] }
  0x49   : > { %464 = vmatprep.subr.mxu0 %v367_v11  ;;  %716 = vmatpush1.msra.mxu1 %v436_v23  ;;  %v356_v32 = vld [vmem:[#allocation5 + $0x50] sm:$0xff]  ;;  %v355_v34 = vld [vmem:[#allocation5 + $0x48] sm:$0xff]  ;;  %v430_v35 = vld [vmem:[#allocation5 + $0x2a0] sm:$0xff]  ;;  %p1324_p6 = pnand %p1323_p7, %p1317_p11 }
  0x4a   : > { %465 = vmatpush1.msra.mxu0 %v366_v12  ;;  %717 = vmatprep.subr.mxu1 %v435_v25  ;;  %v354_v36 = vld [vmem:[#allocation5 + $0x40] sm:$0xff]  ;;  %v429_v37 = vld [vmem:[#allocation5 + $0x298] sm:$0xff]  ;;  %v428_v39 = vld [vmem:[#allocation5 + $0x290] sm:$0xff] }
  0x4b   : > { %466 = vmatprep.subr.mxu0 %v365_v13  ;;  %718 = vmatpush1.msra.mxu1 %v434_v27  ;;  %v353_v38 = vld [vmem:[#allocation5 + $0x38] sm:$0xff]  ;;  %v352_v40 = vld [vmem:[#allocation5 + $0x30] sm:$0xff]  ;;  %v427_v41 = vld [vmem:[#allocation5 + $0x288] sm:$0xff] }
  0x4c   : > { %467 = vmatpush1.msra.mxu0 %v364_v14  ;;  %719 = vmatprep.subr.mxu1 %v433_v29  ;;  %v351_v42 = vld [vmem:[#allocation5 + $0x28] sm:$0xff]  ;;  %v426_v43 = vld [vmem:[#allocation5 + $0x280] sm:$0xff]  ;;  %v425_v45 = vld [vmem:[#allocation5 + $0x278] sm:$0xff] }
  0x4d   : > { %468 = vmatprep.subr.mxu0 %v363_v17  ;;  %720 = vmatpush1.msra.mxu1 %v432_v31  ;;  %v350_v44 = vld [vmem:[#allocation5 + $0x20] sm:$0xff]  ;;  %v349_v46 = vld [vmem:[#allocation5 + $0x18] sm:$0xff]  ;;  %v424_v47 = vld [vmem:[#allocation5 + $0x270] sm:$0xff] }
  0x4e   : > { %469 = vmatpush1.msra.mxu0 %v362_v19  ;;  %721 = vmatprep.subr.mxu1 %v431_v33  ;;  %v348_v48 = vld [vmem:[#allocation5 + $0x10] sm:$0xff]  ;;  %v423_v49 = vld [vmem:[#allocation5 + $0x268] sm:$0xff]  ;;  %v422_v51 = vld [vmem:[#allocation5 + $0x260] sm:$0xff] }
  0x4f   : > { %470 = vmatprep.subr.mxu0 %v361_v22  ;;  %722 = vmatpush1.msra.mxu1 %v430_v35  ;;  %v347_v50 = vld [vmem:[#allocation5 + $0x8] sm:$0xff]  ;;  %v346_v52 = vld [vmem:[#allocation5] sm:$0xff]  ;;  %v421_v53 = vld [vmem:[#allocation5 + $0x258] sm:$0xff] }
  0x50   : > { %471 = vmatpush1.msra.mxu0 %v360_v24  ;;  %723 = vmatprep.subr.mxu1 %v429_v37  ;;  %v409_v54 = vld [vmem:[#allocation5 + $0x1f8] sm:$0xff]  ;;  %v420_v55 = vld [vmem:[#allocation5 + $0x250] sm:$0xff]  ;;  %v419_v57 = vld [vmem:[#allocation5 + $0x248] sm:$0xff] }
  0x51   : > { %472 = vmatprep.subr.mxu0 %v359_v26  ;;  %724 = vmatpush1.msra.mxu1 %v428_v39  ;;  %v408_v56 = vld [vmem:[#allocation5 + $0x1f0] sm:$0xff]  ;;  %v407_v58 = vld [vmem:[#allocation5 + $0x1e8] sm:$0xff]  ;;  %v418_v59 = vld [vmem:[#allocation5 + $0x240] sm:$0xff] }
  0x52   : > { %473 = vmatpush1.msra.mxu0 %v358_v28  ;;  %725 = vmatprep.subr.mxu1 %v427_v41  ;;  %v406_v60 = vld [vmem:[#allocation5 + $0x1e0] sm:$0xff]  ;;  %v417_v61 = vld [vmem:[#allocation5 + $0x238] sm:$0xff]  ;;  %v416_v63 = vld [vmem:[#allocation5 + $0x230] sm:$0xff] }
  0x53   : > { %474 = vmatprep.subr.mxu0 %v357_v30  ;;  %726 = vmatpush1.msra.mxu1 %v426_v43  ;;  %v405_v62 = vld [vmem:[#allocation5 + $0x1d8] sm:$0xff]  ;;  %v404_v1 = vld [vmem:[#allocation5 + $0x1d0] sm:$0xff]  ;;  %v415_v2 = vld [vmem:[#allocation5 + $0x228] sm:$0xff] }
  0x54   : > { %475 = vmatpush1.msra.mxu0 %v356_v32  ;;  %727 = vmatprep.subr.mxu1 %v425_v45  ;;  %v403_v3 = vld [vmem:[#allocation5 + $0x1c8] sm:$0xff]  ;;  %v414_v4 = vld [vmem:[#allocation5 + $0x220] sm:$0xff]  ;;  %v413_v6 = vld [vmem:[#allocation5 + $0x218] sm:$0xff] }
  0x55   : > { %476 = vmatprep.subr.mxu0 %v355_v34  ;;  %728 = vmatpush1.msra.mxu1 %v424_v47  ;;  %v402_v5 = vld [vmem:[#allocation5 + $0x1c0] sm:$0xff]  ;;  %v401_v7 = vld [vmem:[#allocation5 + $0x1b8] sm:$0xff]  ;;  %v412_v8 = vld [vmem:[#allocation5 + $0x210] sm:$0xff] }
  0x56   : > { %477 = vmatpush1.msra.mxu0 %v354_v36  ;;  %729 = vmatprep.subr.mxu1 %v423_v49  ;;  %v400_v9 = vld [vmem:[#allocation5 + $0x1b0] sm:$0xff]  ;;  %v411_v10 = vld [vmem:[#allocation5 + $0x208] sm:$0xff]  ;;  %v398_v13 = vld [vmem:[#allocation5 + $0x1a0] sm:$0xff] }
  0x57   : > { %478 = vmatprep.subr.mxu0 %v353_v38  ;;  %730 = vmatpush1.msra.mxu1 %v422_v51  ;;  %v399_v11 = vld [vmem:[#allocation5 + $0x1a8] sm:$0xff]  ;;  %v410_v14 = vld [vmem:[#allocation5 + $0x200] sm:$0xff]  ;;  %v397_v15 = vld [vmem:[#allocation5 + $0x198] sm:$0xff] }
  0x58   : > { %479 = vmatpush1.msra.mxu0 %v352_v40  ;;  %731 = vmatprep.subr.mxu1 %v421_v53  ;;  %v251_v12 = vld [vmem:[%s1543_s21 + $0x8] sm:$0xff]  ;;  %v252_v16 = vld [vmem:[%s1543_s21 + $0x10] sm:$0xff]  ;;  %v394_v19 = vld [vmem:[#allocation5 + $0x180] sm:$0xff] }
  0x59   : > { %480 = vmatprep.subr.mxu0 %v351_v42  ;;  %732 = vmatpush1.msra.mxu1 %v420_v55  ;;  %v396_v17 = vld [vmem:[#allocation5 + $0x190] sm:$0xff]  ;;  %v395_v18 = vld [vmem:[#allocation5 + $0x188] sm:$0xff]  ;;  %v393_v20 = vld [vmem:[#allocation5 + $0x178] sm:$0xff] }
  0x5a   : > { %481 = vmatpush1.msra.mxu0 %v350_v44  ;;  %733 = vmatprep.subr.mxu1 %v419_v57  ;;  %v255_v21 = vld [vmem:[%s1543_s21 + $0x28] sm:$0xff]  ;;  %v392_v22 = vld [vmem:[#allocation5 + $0x170] sm:$0xff]  ;;  %v390_v24 = vld [vmem:[#allocation5 + $0x160] sm:$0xff] }
  0x5b   : > { %482 = vmatprep.subr.mxu0 %v349_v46  ;;  %734 = vmatpush1.msra.mxu1 %v418_v59  ;;  %v391_v23 = vld [vmem:[#allocation5 + $0x168] sm:$0xff]  ;;  %v389_v25 = vld [vmem:[#allocation5 + $0x158] sm:$0xff]  ;;  %v258_v26 = vld [vmem:[%s1543_s21 + $0x40] sm:$0xff] }
  0x5c   : > { %483 = vmatpush1.msra.mxu0 %v348_v48  ;;  %735 = vmatprep.subr.mxu1 %v417_v61  ;;  %v388_v27 = vld [vmem:[#allocation5 + $0x150] sm:$0xff]  ;;  %v387_v28 = vld [vmem:[#allocation5 + $0x148] sm:$0xff]  ;;  %v386_v29 = vld [vmem:[#allocation5 + $0x140] sm:$0xff] }
  0x5d   : > { %484 = vmatprep.subr.mxu0 %v347_v50  ;;  %736 = vmatpush1.msra.mxu1 %v416_v63  ;;  %v385_v30 = vld [vmem:[#allocation5 + $0x138] sm:$0xff]  ;;  %v384_v32 = vld [vmem:[#allocation5 + $0x130] sm:$0xff]  ;;  %v383_v33 = vld [vmem:[#allocation5 + $0x128] sm:$0xff] }
  0x5e   : > { %485 = vmatpush1.msra.mxu0 %v346_v52  ;;  %737 = vmatprep.subr.mxu1 %v415_v2  ;;  %v261_v31 = vld [vmem:[%s1543_s21 + $0x58] sm:$0xff]  ;;  %v382_v34 = vld [vmem:[#allocation5 + $0x120] sm:$0xff]  ;;  %v264_v36 = vld [vmem:[%s1543_s21 + $0x70] sm:$0xff] }
  0x5f   : > { %486 = vmatprep.subr.mxu0 %v409_v54  ;;  %738 = vmatpush1.msra.mxu1 %v414_v4  ;;  %v381_v35 = vld [vmem:[#allocation5 + $0x118] sm:$0xff]  ;;  %v380_v37 = vld [vmem:[#allocation5 + $0x110] sm:$0xff]  ;;  %v379_v38 = vld [vmem:[#allocation5 + $0x108] sm:$0xff] }
  0x60   : > { %487 = vmatpush2.msra.mxu0 %v408_v56  ;;  %739 = vmatprep.subr.mxu1 %v413_v6  ;;  %v378_v39 = vld [vmem:[#allocation5 + $0x100] sm:$0xff]  ;;  %v267_v41 = vld [vmem:[%s1543_s21 + $0x88] sm:$0xff]  ;;  %v253_v43 = vld [vmem:[%s1543_s21 + $0x18] sm:$0xff] }
  0x61   : > { %488 = vmatprep.subr.mxu0 %v407_v58  ;;  %740 = vmatpush1.msra.mxu1 %v412_v8  ;;  %v250_v40 = vld [vmem:[%s1543_s21] sm:$0xff]  ;;  %v257_v45 = vld [vmem:[%s1543_s21 + $0x38] sm:$0xff]  ;;  %v256_v46 = vld [vmem:[%s1543_s21 + $0x30] sm:$0xff] }
  0x62   : > { %489 = vmatpush2.msra.mxu0 %v406_v60  ;;  %741 = vmatprep.subr.mxu1 %v411_v10  ;;  %v254_v42 = vld [vmem:[%s1543_s21 + $0x20] sm:$0xff]  ;;  %v273_v47 = vld [vmem:[%s1543_s21 + $0xb8] sm:$0xff]  ;;  %v260_v48 = vld [vmem:[%s1543_s21 + $0x50] sm:$0xff] }
  0x63   : > { %490 = vmatprep.subr.mxu0 %v405_v62  ;;  %518 = vmatprep.mubr.f32.mxu0 %v251_v12  ;;  %v270_v44 = vld [vmem:[%s1543_s21 + $0xa0] sm:$0xff]  ;;  %v259_v49 = vld [vmem:[%s1543_s21 + $0x48] sm:$0xff]  ;;  %v276_v50 = vld [vmem:[%s1543_s21 + $0xd0] sm:$0xff] }
  0x64   : > { %491 = vmatpush2.msra.mxu0 %v404_v1  ;;  %742 = vmatpush1.msra.mxu1 %v410_v14  ;;  %v263_v51 = vld [vmem:[%s1543_s21 + $0x68] sm:$0xff]  ;;  %v262_v52 = vld [vmem:[%s1543_s21 + $0x60] sm:$0xff]  ;;  %v265_v55 = vld [vmem:[%s1543_s21 + $0x78] sm:$0xff] }
  0x65   : > { %492 = vmatprep.subr.mxu0 %v403_v3  ;;  %776 = vmatmul.mubr.f32.vlgmr.msra.gmra.mxu1 %v252_v16  ;;  %v279_v53 = vld [vmem:[%s1543_s21 + $0xe8] sm:$0xff]  ;;  %v266_v54 = vld [vmem:[%s1543_s21 + $0x80] sm:$0xff]  ;;  %v269_v57 = vld [vmem:[%s1543_s21 + $0x98] sm:$0xff] }
  0x66   : > { %493 = vmatpush2.msra.mxu0 %v402_v5  ;;  %781 = vmatprep.mubr.f32.mxu1 %v1406_v0  ;;  %v282_v56 = vld [vmem:[%s1543_s21 + $0x100] sm:$0xff]  ;;  %v268_v58 = vld [vmem:[%s1543_s21 + $0x90] sm:$0xff]  ;;  %v285_v59 = vld [vmem:[%s1543_s21 + $0x118] sm:$0xff] }
  0x67   : > { %494 = vmatprep.subr.mxu0 %v401_v7  ;;  %v272_v60 = vld [vmem:[%s1543_s21 + $0xb0] sm:$0xff]  ;;  %v271_v61 = vld [vmem:[%s1543_s21 + $0xa8] sm:$0xff]  ;;  %v274_v1 = vld [vmem:[%s1543_s21 + $0xc0] sm:$0xff] }
  0x68   : > { %495 = vmatpush2.msra.mxu0 %v400_v9  ;;  %v288_v62 = vld [vmem:[%s1543_s21 + $0x130] sm:$0xff]  ;;  %v275_v63 = vld [vmem:[%s1543_s21 + $0xc8] sm:$0xff]  ;;  %v278_v3 = vld [vmem:[%s1543_s21 + $0xe0] sm:$0xff] }
  0x69   : > { %496 = vmatprep.subr.mxu0 %v399_v11  ;;  %782 = vmatmul.mubr.f32.gmra.mxu1 %v255_v21  ;;  %v291_v2 = vld [vmem:[%s1543_s21 + $0x148] sm:$0xff]  ;;  %v277_v4 = vld [vmem:[%s1543_s21 + $0xd8] sm:$0xff]  ;;  %v294_v5 = vld [vmem:[%s1543_s21 + $0x160] sm:$0xff] }
  0x6a   : > { %497 = vmatpush2.msra.mxu0 %v398_v13  ;;  %787 = vmatprep.mubr.f32.mxu1 %v1406_v0  ;;  %v281_v6 = vld [vmem:[%s1543_s21 + $0xf8] sm:$0xff]  ;;  %v280_v7 = vld [vmem:[%s1543_s21 + $0xf0] sm:$0xff]  ;;  %v283_v10 = vld [vmem:[%s1543_s21 + $0x108] sm:$0xff] }
  0x6b   : > { %498 = vmatprep.subr.mxu0 %v397_v15  ;;  %v297_v8 = vld [vmem:[%s1543_s21 + $0x178] sm:$0xff]  ;;  %v284_v9 = vld [vmem:[%s1543_s21 + $0x110] sm:$0xff]  ;;  %v287_v12 = vld [vmem:[%s1543_s21 + $0x128] sm:$0xff] }
  0x6c   : > { %499 = vmatpush2.msra.mxu0 %v396_v17  ;;  %v300_v11 = vld [vmem:[%s1543_s21 + $0x190] sm:$0xff]  ;;  %v286_v13 = vld [vmem:[%s1543_s21 + $0x120] sm:$0xff]  ;;  %v303_v14 = vld [vmem:[%s1543_s21 + $0x1a8] sm:$0xff] }
  0x6d   : > { %500 = vmatprep.subr.mxu0 %v395_v18  ;;  %788 = vmatmul.mubr.f32.gmra.mxu1 %v258_v26  ;;  %v290_v15 = vld [vmem:[%s1543_s21 + $0x140] sm:$0xff]  ;;  %v289_v16 = vld [vmem:[%s1543_s21 + $0x138] sm:$0xff]  ;;  %v296_v21 = vld [vmem:[%s1543_s21 + $0x170] sm:$0xff] }
  0x6e   : > { %501 = vmatpush2.msra.mxu0 %v394_v19  ;;  %793 = vmatprep.mubr.f32.mxu1 %v1406_v0  ;;  %v306_v17 = vld [vmem:[%s1543_s21 + $0x1c0] sm:$0xff]  ;;  %v293_v18 = vld [vmem:[%s1543_s21 + $0x158] sm:$0xff]  ;;  %v292_v19 = vld [vmem:[%s1543_s21 + $0x150] sm:$0xff] }
  0x6f   : > { %502 = vmatprep.subr.mxu0 %v393_v20  ;;  %v309_v20 = vld [vmem:[%s1543_s21 + $0x1d8] sm:$0xff]  ;;  %v315_v26 = vld [vmem:[%s1543_s21 + $0x208] sm:$0xff] }
  0x70   : > { %503 = vmatpush2.msra.mxu0 %v392_v22  ;;  %v295_v22 = vld [vmem:[%s1543_s21 + $0x168] sm:$0xff] }
  0x71   : > { %504 = vmatprep.subr.mxu0 %v391_v23  ;;  %794 = vmatmul.mubr.f32.gmra.mxu1 %v261_v31  ;;  %v312_v23 = vld [vmem:[%s1543_s21 + $0x1f0] sm:$0xff] }
  0x72   : > { %505 = vmatpush2.msra.mxu0 %v390_v24  ;;  %799 = vmatprep.mubr.f32.mxu1 %v1406_v0  ;;  %v299_v24 = vld [vmem:[%s1543_s21 + $0x188] sm:$0xff]  ;;  %v304_v31 = vld [vmem:[%s1543_s21 + $0x1b0] sm:$0xff] }
  0x73   : > { %506 = vmatprep.subr.mxu0 %v389_v25  ;;  %v298_v25 = vld [vmem:[%s1543_s21 + $0x180] sm:$0xff] }
  0x74   : > { %507 = vmatpush2.msra.mxu0 %v388_v27  ;;  %v302_v27 = vld [vmem:[%s1543_s21 + $0x1a0] sm:$0xff] }
  0x75   : > { %508 = vmatprep.subr.mxu0 %v387_v28  ;;  %800 = vmatmul.mubr.f32.gmra.mxu1 %v264_v36  ;;  %v301_v28 = vld [vmem:[%s1543_s21 + $0x198] sm:$0xff]  ;;  %v311_v36 = vld [vmem:[%s1543_s21 + $0x1e8] sm:$0xff] }
  0x76   : > { %509 = vmatpush2.msra.mxu0 %v386_v29  ;;  %805 = vmatprep.mubr.f32.mxu1 %v1406_v0  ;;  %v318_v29 = vld [vmem:[%s1543_s21 + $0x220] sm:$0xff] }
  0x77   : > { %510 = vmatprep.subr.mxu0 %v385_v30  ;;  %v305_v30 = vld [vmem:[%s1543_s21 + $0x1b8] sm:$0xff] }
  0x78   : > { %511 = vmatpush2.msra.mxu0 %v384_v32  ;;  %v321_v32 = vld [vmem:[%s1543_s21 + $0x238] sm:$0xff] }
  0x79   : > { %512 = vmatprep.subr.mxu0 %v383_v33  ;;  %806 = vmatmul.mubr.f32.gmra.mxu1 %v267_v41  ;;  %v308_v33 = vld [vmem:[%s1543_s21 + $0x1d0] sm:$0xff]  ;;  %v330_v41 = vld [vmem:[%s1543_s21 + $0x280] sm:$0xff] }
  0x7a   : > { %513 = vmatpush2.msra.mxu0 %v382_v34  ;;  %811 = vmatprep.mubr.f32.mxu1 %v1406_v0  ;;  %v307_v34 = vld [vmem:[%s1543_s21 + $0x1c8] sm:$0xff] }
  0x7b   : > { %514 = vmatprep.subr.mxu0 %v381_v35  ;;  %v324_v35 = vld [vmem:[%s1543_s21 + $0x250] sm:$0xff] }
  0x7c   : > { %515 = vmatpush2.msra.mxu0 %v380_v37  ;;  %v310_v37 = vld [vmem:[%s1543_s21 + $0x1e0] sm:$0xff] }
  0x7d   : > { %516 = vmatprep.subr.mxu0 %v379_v38  ;;  %812 = vmatmul.mubr.f32.gmra.mxu1 %v270_v44  ;;  %v327_v38 = vld [vmem:[%s1543_s21 + $0x268] sm:$0xff]  ;;  %v333_v44 = vld [vmem:[%s1543_s21 + $0x298] sm:$0xff] }
  0x7e   : > { %517 = vmatpush2.msra.mxu0 %v378_v39  ;;  %817 = vmatprep.mubr.f32.mxu1 %v1406_v0  ;;  %v314_v39 = vld [vmem:[%s1543_s21 + $0x200] sm:$0xff] }
  0x7f   : > { %519 = vmatmul.mubr.f32.vlgmr.msra.gmra.mxu0 %v250_v40  ;;  %v313_v40 = vld [vmem:[%s1543_s21 + $0x1f8] sm:$0xff] }
  0x80   : > { %524 = vmatprep.mubr.f32.mxu0 %v254_v42  ;;  %v317_v42 = vld [vmem:[%s1543_s21 + $0x218] sm:$0xff] }
  0x81   : > { %818 = vmatmul.mubr.f32.gmra.mxu1 %v273_v47  ;;  %v336_v47 = vld [vmem:[%s1543_s21 + $0x2b0] sm:$0xff] }
  0x82   : > { %823 = vmatprep.mubr.f32.mxu1 %v1406_v0 }
  0x83   : > { %525 = vmatmul.mubr.f32.gmra.mxu0 %v253_v43  ;;  %v316_v43 = vld [vmem:[%s1543_s21 + $0x210] sm:$0xff] }
  0x84   : > { %530 = vmatprep.mubr.f32.mxu0 %v257_v45  ;;  %v320_v45 = vld [vmem:[%s1543_s21 + $0x230] sm:$0xff] }
  0x85   : > { %824 = vmatmul.mubr.f32.gmra.mxu1 %v276_v50  ;;  %v339_v50 = vld [vmem:[%s1543_s21 + $0x2c8] sm:$0xff] }
  0x86   : > { %829 = vmatprep.mubr.f32.mxu1 %v1406_v0 }
  0x87   : > { %531 = vmatmul.mubr.f32.gmra.mxu0 %v256_v46  ;;  %v319_v46 = vld [vmem:[%s1543_s21 + $0x228] sm:$0xff] }
  0x88   : > { %536 = vmatprep.mubr.f32.mxu0 %v260_v48  ;;  %v323_v48 = vld [vmem:[%s1543_s21 + $0x248] sm:$0xff] }
  0x89   : > { %830 = vmatmul.mubr.f32.gmra.mxu1 %v279_v53  ;;  %v342_v53 = vld [vmem:[%s1543_s21 + $0x2e0] sm:$0xff] }
  0x8a   : > { %835 = vmatprep.mubr.f32.mxu1 %v1406_v0 }
  0x8b   : > { %537 = vmatmul.mubr.f32.gmra.mxu0 %v259_v49  ;;  %v322_v49 = vld [vmem:[%s1543_s21 + $0x240] sm:$0xff] }
  0x8c   : > { %542 = vmatprep.mubr.f32.mxu0 %v263_v51  ;;  %v326_v51 = vld [vmem:[%s1543_s21 + $0x260] sm:$0xff] }
  0x8d   : > { %836 = vmatmul.mubr.f32.gmra.mxu1 %v282_v56  ;;  %v345_v56 = vld [vmem:[%s1543_s21 + $0x2f8] sm:$0xff] }
  0x8e   : > { %841 = vmatprep.mubr.f32.mxu1 %v1406_v0 }
  0x8f   : > { %543 = vmatmul.mubr.f32.gmra.mxu0 %v262_v52  ;;  %v325_v52 = vld [vmem:[%s1543_s21 + $0x258] sm:$0xff] }
  0x90   : > { %548 = vmatprep.mubr.f32.mxu0 %v266_v54  ;;  %v329_v54 = vld [vmem:[%s1543_s21 + $0x278] sm:$0xff] }
  0x91   : > { %842 = vmatmul.mubr.f32.gmra.mxu1 %v285_v59  ;;  %v335_v59 = vld [vmem:[%s1543_s21 + $0x2a8] sm:$0xff] }
  0x92   : > { %847 = vmatprep.mubr.f32.mxu1 %v1406_v0 }
  0x93   : > { %549 = vmatmul.mubr.f32.gmra.mxu0 %v265_v55  ;;  %v328_v55 = vld [vmem:[%s1543_s21 + $0x270] sm:$0xff] }
  0x94   : > { %554 = vmatprep.mubr.f32.mxu0 %v269_v57  ;;  %v332_v57 = vld [vmem:[%s1543_s21 + $0x290] sm:$0xff] }
  0x95   : > { %848 = vmatmul.mubr.f32.gmra.mxu1 %v288_v62  ;;  %v337_v62 = vld [vmem:[%s1543_s21 + $0x2b8] sm:$0xff] }
  0x96   : > { %853 = vmatprep.mubr.f32.mxu1 %v1406_v0 }
  0x97   : > { %555 = vmatmul.mubr.f32.gmra.mxu0 %v268_v58  ;;  %v331_v58 = vld [vmem:[%s1543_s21 + $0x288] sm:$0xff] }
  0x98   : > { %560 = vmatprep.mubr.f32.mxu0 %v272_v60  ;;  %v334_v60 = vld [vmem:[%s1543_s21 + $0x2a0] sm:$0xff] }
  0x99   : > { %854 = vmatmul.mubr.f32.gmra.mxu1 %v291_v2  ;;  %v343_v2 = vld [vmem:[%s1543_s21 + $0x2e8] sm:$0xff] }
  0x9a   : > { %859 = vmatprep.mubr.f32.mxu1 %v1406_v0 }
  0x9b   : > { %561 = vmatmul.mubr.f32.gmra.mxu0 %v271_v61  ;;  %v338_v61 = vld [vmem:[%s1543_s21 + $0x2c0] sm:$0xff] }
  0x9c   : > { %566 = vmatprep.mubr.f32.mxu0 %v275_v63  ;;  %v341_v63 = vld [vmem:[%s1543_s21 + $0x2d8] sm:$0xff] }
  0x9d   : > { %860 = vmatmul.mubr.f32.gmra.mxu1 %v294_v5 }
  0x9e   : > { %865 = vmatprep.mubr.f32.mxu1 %v1406_v0 }
  0x9f   : > { %567 = vmatmul.mubr.f32.gmra.mxu0 %v274_v1  ;;  %v344_v1 = vld [vmem:[%s1543_s21 + $0x2f0] sm:$0xff] }
  0xa0   : > { %572 = vmatprep.mubr.f32.mxu0 %v278_v3 }
  0xa1   : > { %866 = vmatmul.mubr.f32.gmra.mxu1 %v297_v8 }
  0xa2   : > { %871 = vmatprep.mubr.f32.mxu1 %v1406_v0 }
  0xa3   : > { %573 = vmatmul.mubr.f32.gmra.mxu0 %v277_v4 }
  0xa4   : > { %578 = vmatprep.mubr.f32.mxu0 %v281_v6  ;;  %v444_v6 = vlaneseq }
  0xa5   : > { %872 = vmatmul.mubr.f32.gmra.mxu1 %v300_v11 }
  0xa6   : > { %877 = vmatprep.mubr.f32.mxu1 %v1406_v0 }
  0xa7   : > { %579 = vmatmul.mubr.f32.gmra.mxu0 %v280_v7 }
  0xa8   : > { %584 = vmatprep.mubr.f32.mxu0 %v284_v9  ;;  %v445_v9 = vshrl.u32 %v444_v6, 7 }
  0xa9   : > { %878 = vmatmul.mubr.f32.gmra.mxu1 %v303_v14 }
  0xaa   : > { %883 = vmatprep.mubr.f32.mxu1 %v1406_v0 }
  0xab   : > { %585 = vmatmul.mubr.f32.gmra.mxu0 %v283_v10 }
  0xac   : > { %590 = vmatprep.mubr.f32.mxu0 %v287_v12  ;;  %v446_v12 = vsub.s32 0, %v445_v9 }
  0xad   : > { %884 = vmatmul.mubr.f32.gmra.mxu1 %v306_v17 }
  0xae   : > { %889 = vmatprep.mubr.f32.mxu1 %v1406_v0 }
  0xaf   : > { %591 = vmatmul.mubr.f32.gmra.mxu0 %v286_v13  ;;  %v442_v13 = vld [vmem:[%s1876_s2] sm:$0x3] }
  0xb0   : > { %596 = vmatprep.mubr.f32.mxu0 %v290_v15  ;;  %v450_v15 = vsub.s32 1, %v445_v9  ;;  %v1684_v17 = vrot.slane %v442_v13, %v446_v12 }
  0xb1   : > { %890 = vmatmul.mubr.f32.gmra.mxu1 %v309_v20 }
  0xb2   : > { %895 = vmatprep.mubr.f32.mxu1 %v1406_v0 }
  0xb3   : > { %597 = vmatmul.mubr.f32.gmra.mxu0 %v289_v16 }
  0xb4   : > { %602 = vmatprep.mubr.f32.mxu0 %v293_v18 }
  0xb5   : > { %896 = vmatmul.mubr.f32.gmra.mxu1 %v312_v23 }
  0xb6   : > { %901 = vmatprep.mubr.f32.mxu1 %v1406_v0 }
  0xb7   : > { %603 = vmatmul.mubr.f32.gmra.mxu0 %v292_v19  ;;  %v1687_v19 = vrot.slane %v442_v13, %v450_v15 }
  0xb8   : > { %608 = vmatprep.mubr.f32.mxu0 %v296_v21 }
  0xb9   : > { %902 = vmatmul.mubr.f32.gmra.mxu1 %v315_v26 }
  0xba   : > { %907 = vmatprep.mubr.f32.mxu1 %v1406_v0 }
  0xbb   : > { %609 = vmatmul.mubr.f32.gmra.mxu0 %v295_v22 }
  0xbc   : > { %614 = vmatprep.mubr.f32.mxu0 %v299_v24 }
  0xbd   : > { %908 = vmatmul.mubr.f32.gmra.mxu1 %v318_v29 }
  0xbe   : > { %913 = vmatprep.mubr.f32.mxu1 %v1406_v0 }
  0xbf   : > { %615 = vmatmul.mubr.f32.gmra.mxu0 %v298_v25 }
  0xc0   : > { %620 = vmatprep.mubr.f32.mxu0 %v302_v27 }
  0xc1   : > { %914 = vmatmul.mubr.f32.gmra.mxu1 %v321_v32 }
  0xc2   : > { %919 = vmatprep.mubr.f32.mxu1 %v1406_v0 }
  0xc3   : > { %621 = vmatmul.mubr.f32.gmra.mxu0 %v301_v28 }
  0xc4   : > { %626 = vmatprep.mubr.f32.mxu0 %v305_v30 }
  0xc5   : > { %920 = vmatmul.mubr.f32.gmra.mxu1 %v324_v35 }
  0xc6   : > { %925 = vmatprep.mubr.f32.mxu1 %v1406_v0 }
  0xc7   : > { %627 = vmatmul.mubr.f32.gmra.mxu0 %v304_v31 }
  0xc8   : > { %632 = vmatprep.mubr.f32.mxu0 %v308_v33 }
  0xc9   : > { %926 = vmatmul.mubr.f32.gmra.mxu1 %v327_v38 }
  0xca   : > { %931 = vmatprep.mubr.f32.mxu1 %v1406_v0 }
  0xcb   : > { %633 = vmatmul.mubr.f32.gmra.mxu0 %v307_v34 }
  0xcc   : > { %638 = vmatprep.mubr.f32.mxu0 %v311_v36 }
  0xcd   : > { %932 = vmatmul.mubr.f32.gmra.mxu1 %v330_v41 }
  0xce   : > { %937 = vmatprep.mubr.f32.mxu1 %v1406_v0 }
  0xcf   : > { %639 = vmatmul.mubr.f32.gmra.mxu0 %v310_v37 }
  0xd0   : > { %644 = vmatprep.mubr.f32.mxu0 %v314_v39 }
  0xd1   : > { %938 = vmatmul.mubr.f32.gmra.mxu1 %v333_v44 }
  0xd2   : > { %943 = vmatprep.mubr.f32.mxu1 %v1406_v0 }
  0xd3   : > { %645 = vmatmul.mubr.f32.gmra.mxu0 %v313_v40 }
  0xd4   : > { %650 = vmatprep.mubr.f32.mxu0 %v317_v42 }
  0xd5   : > { %944 = vmatmul.mubr.f32.gmra.mxu1 %v336_v47 }
  0xd6   : > { %949 = vmatprep.mubr.f32.mxu1 %v1406_v0 }
  0xd7   : > { %651 = vmatmul.mubr.f32.gmra.mxu0 %v316_v43 }
  0xd8   : > { %656 = vmatprep.mubr.f32.mxu0 %v320_v45 }
  0xd9   : > { %950 = vmatmul.mubr.f32.gmra.mxu1 %v339_v50 }
  0xda   : > { %955 = vmatprep.mubr.f32.mxu1 %v1406_v0 }
  0xdb   : > { %657 = vmatmul.mubr.f32.gmra.mxu0 %v319_v46 }
  0xdc   : > { %662 = vmatprep.mubr.f32.mxu0 %v323_v48 }
  0xdd   : > { %956 = vmatmul.mubr.f32.gmra.mxu1 %v342_v53 }
  0xde   : > { %961 = vmatprep.mubr.f32.mxu1 %v1406_v0  ;;  %v340_v0 = vld [vmem:[%s1543_s21 + $0x2d0] sm:$0xff] }
  0xdf   : > { %663 = vmatmul.mubr.f32.gmra.mxu0 %v322_v49 }
  0xe0   : > { %668 = vmatprep.mubr.f32.mxu0 %v326_v51 }
  0xe1   : > { %962 = vmatmul.mubr.f32.gmra.mxu1 %v345_v56 }
  0xe3   : > { %669 = vmatmul.mubr.f32.gmra.mxu0 %v325_v52 }
  0xe4   : > { %674 = vmatprep.mubr.f32.mxu0 %v329_v54 }
  0xe7   : > { %675 = vmatmul.mubr.f32.gmra.mxu0 %v328_v55 }
  0xe8   : > { %680 = vmatprep.mubr.f32.mxu0 %v332_v57 }
  0xeb   : > { %681 = vmatmul.mubr.f32.gmra.mxu0 %v331_v58 }
  0xec   : > { %686 = vmatprep.mubr.f32.mxu0 %v335_v59 }
  0xef   : > { %687 = vmatmul.mubr.f32.gmra.mxu0 %v334_v60 }
  0xf0   : > { %692 = vmatprep.mubr.f32.mxu0 %v338_v61 }
  0xf3   : > { %693 = vmatmul.mubr.f32.gmra.mxu0 %v337_v62 }
  0xf4   : > { %698 = vmatprep.mubr.f32.mxu0 %v341_v63 }
  0xf7   : > { %699 = vmatmul.mubr.f32.gmra.mxu0 %v340_v0 }
  0xf8   : > { %704 = vmatprep.mubr.f32.mxu0 %v344_v1 }
  0xfb   : > { %705 = vmatmul.mubr.f32.gmra.mxu0 %v343_v2 }
 0x125   : > { %v777_v3 = vpop.f32.mrf.mxu1 }
 0x127   : > { %v779_v4 = vpop.f32.mrf.mxu1 }
 0x129   : > { %v783_v5 = vpop.f32.mrf.mxu1 }
 0x12b   : > { %v785_v7 = vpop.f32.mrf.mxu1 }
 0x12d   : > { %v789_v8 = vpop.f32.mrf.mxu1 }
 0x12f   : > { %v791_v10 = vpop.f32.mrf.mxu1 }
 0x131   : > { %v795_v11 = vpop.f32.mrf.mxu1 }
 0x133   : > { %v797_v14 = vpop.f32.mrf.mxu1 }
 0x135   : > { %v801_v16 = vpop.f32.mrf.mxu1 }
 0x137   : > { %v803_v18 = vpop.f32.mrf.mxu1 }
 0x139   : > { %v807_v21 = vpop.f32.mrf.mxu1 }
 0x13b   : > { %v809_v24 = vpop.f32.mrf.mxu1 }
 0x13d   : > { %v813_v28 = vpop.f32.mrf.mxu1 }
 0x13f   : > { %v520_v20 = vpop.f32.mrf.mxu0  ;;  %v815_v32 = vpop.f32.mrf.mxu1 }
 0x140   : > { %v521_v22 = vadd.f32 %v520_v20, %v1684_v17 }
 0x141   : > { %v522_v23 = vpop.f32.mrf.mxu0  ;;  %v819_v36 = vpop.f32.mrf.mxu1 }
 0x142   : > { %v778_v25 = vadd.f32 %v777_v3, %v521_v22  ;;  %v523_v26 = vadd.f32 %v522_v23, %v1687_v19 }
 0x143   : > { %v526_v27 = vpop.f32.mrf.mxu0  ;;  %v821_v40 = vpop.f32.mrf.mxu1 }
 0x144   : > { %968 = vst [vmem:[%s1691_s26] sm:$0xff] %v778_v25  ;;  %v780_v29 = vadd.f32 %v779_v4, %v523_v26  ;;  %v527_v30 = vadd.f32 %v526_v27, %v1684_v17 }
 0x145   : > { %v528_v31 = vpop.f32.mrf.mxu0  ;;  %v825_v44 = vpop.f32.mrf.mxu1 }
 0x146   : > { %969 = vst [vmem:[%s1691_s26 + $0x8] sm:$0xff] %v780_v29  ;;  %v784_v33 = vadd.f32 %v783_v5, %v527_v30  ;;  %v529_v34 = vadd.f32 %v528_v31, %v1687_v19 }
 0x147   : > { %v532_v35 = vpop.f32.mrf.mxu0  ;;  %v827_v48 = vpop.f32.mrf.mxu1 }
 0x148   : > { %970 = vst [vmem:[%s1691_s26 + $0x10] sm:$0xff] %v784_v33  ;;  %v786_v37 = vadd.f32 %v785_v7, %v529_v34  ;;  %v533_v38 = vadd.f32 %v532_v35, %v1684_v17 }
 0x149   : > { %v534_v39 = vpop.f32.mrf.mxu0  ;;  %v831_v52 = vpop.f32.mrf.mxu1 }
 0x14a   : > { %971 = vst [vmem:[%s1691_s26 + $0x18] sm:$0xff] %v786_v37  ;;  %v790_v41 = vadd.f32 %v789_v8, %v533_v38  ;;  %v535_v42 = vadd.f32 %v534_v39, %v1687_v19 }
 0x14b   : > { %v538_v43 = vpop.f32.mrf.mxu0  ;;  %v833_v56 = vpop.f32.mrf.mxu1 }
 0x14c   : > { %972 = vst [vmem:[%s1691_s26 + $0x20] sm:$0xff] %v790_v41  ;;  %v792_v45 = vadd.f32 %v791_v10, %v535_v42  ;;  %v539_v46 = vadd.f32 %v538_v43, %v1684_v17 }
 0x14d   : > { %v540_v47 = vpop.f32.mrf.mxu0  ;;  %v837_v60 = vpop.f32.mrf.mxu1 }
 0x14e   : > { %973 = vst [vmem:[%s1691_s26 + $0x28] sm:$0xff] %v792_v45  ;;  %v796_v49 = vadd.f32 %v795_v11, %v539_v46  ;;  %v541_v50 = vadd.f32 %v540_v47, %v1687_v19 }
 0x14f   : > { %v544_v51 = vpop.f32.mrf.mxu0  ;;  %v839_v0 = vpop.f32.mrf.mxu1 }
 0x150   : > { %974 = vst [vmem:[%s1691_s26 + $0x30] sm:$0xff] %v796_v49  ;;  %v798_v53 = vadd.f32 %v797_v14, %v541_v50  ;;  %v545_v54 = vadd.f32 %v544_v51, %v1684_v17 }
 0x151   : > { %v546_v55 = vpop.f32.mrf.mxu0  ;;  %v843_v4 = vpop.f32.mrf.mxu1 }
 0x152   : > { %975 = vst [vmem:[%s1691_s26 + $0x38] sm:$0xff] %v798_v53  ;;  %v802_v57 = vadd.f32 %v801_v16, %v545_v54  ;;  %v547_v58 = vadd.f32 %v546_v55, %v1687_v19 }
 0x153   : > { %v550_v59 = vpop.f32.mrf.mxu0  ;;  %v845_v8 = vpop.f32.mrf.mxu1 }
 0x154   : > { %976 = vst [vmem:[%s1691_s26 + $0x40] sm:$0xff] %v802_v57  ;;  %v804_v61 = vadd.f32 %v803_v18, %v547_v58  ;;  %v551_v62 = vadd.f32 %v550_v59, %v1684_v17 }
 0x155   : > { %v552_v63 = vpop.f32.mrf.mxu0  ;;  %v849_v12 = vpop.f32.mrf.mxu1 }
 0x156   : > { %977 = vst [vmem:[%s1691_s26 + $0x48] sm:$0xff] %v804_v61  ;;  %v808_v1 = vadd.f32 %v807_v21, %v551_v62  ;;  %v553_v2 = vadd.f32 %v552_v63, %v1687_v19 }
 0x157   : > { %v556_v3 = vpop.f32.mrf.mxu0  ;;  %v851_v16 = vpop.f32.mrf.mxu1 }
 0x158   : > { %978 = vst [vmem:[%s1691_s26 + $0x50] sm:$0xff] %v808_v1  ;;  %v810_v5 = vadd.f32 %v809_v24, %v553_v2  ;;  %v557_v6 = vadd.f32 %v556_v3, %v1684_v17 }
 0x159   : > { %v558_v7 = vpop.f32.mrf.mxu0  ;;  %v855_v22 = vpop.f32.mrf.mxu1 }
 0x15a   : > { %979 = vst [vmem:[%s1691_s26 + $0x58] sm:$0xff] %v810_v5  ;;  %v814_v9 = vadd.f32 %v813_v28, %v557_v6  ;;  %v559_v10 = vadd.f32 %v558_v7, %v1687_v19 }
 0x15b   : > { %v562_v11 = vpop.f32.mrf.mxu0  ;;  %v857_v26 = vpop.f32.mrf.mxu1 }
 0x15c   : > { %980 = vst [vmem:[%s1691_s26 + $0x60] sm:$0xff] %v814_v9  ;;  %v816_v13 = vadd.f32 %v815_v32, %v559_v10  ;;  %v563_v14 = vadd.f32 %v562_v11, %v1684_v17 }
 0x15d   : > { %v564_v15 = vpop.f32.mrf.mxu0  ;;  %v861_v30 = vpop.f32.mrf.mxu1 }
 0x15e   : > { %981 = vst [vmem:[%s1691_s26 + $0x68] sm:$0xff] %v816_v13  ;;  %v820_v18 = vadd.f32 %v819_v36, %v563_v14  ;;  %v565_v20 = vadd.f32 %v564_v15, %v1687_v19 }
 0x15f   : > { %v568_v21 = vpop.f32.mrf.mxu0  ;;  %v863_v34 = vpop.f32.mrf.mxu1 }
 0x160   : > { %982 = vst [vmem:[%s1691_s26 + $0x70] sm:$0xff] %v820_v18  ;;  %v822_v23 = vadd.f32 %v821_v40, %v565_v20  ;;  %v569_v24 = vadd.f32 %v568_v21, %v1684_v17 }
 0x161   : > { %v570_v25 = vpop.f32.mrf.mxu0  ;;  %v867_v38 = vpop.f32.mrf.mxu1 }
 0x162   : > { %983 = vst [vmem:[%s1691_s26 + $0x78] sm:$0xff] %v822_v23  ;;  %v826_v27 = vadd.f32 %v825_v44, %v569_v24  ;;  %v571_v28 = vadd.f32 %v570_v25, %v1687_v19 }
 0x163   : > { %v574_v29 = vpop.f32.mrf.mxu0  ;;  %v869_v42 = vpop.f32.mrf.mxu1 }
 0x164   : > { %984 = vst [vmem:[%s1691_s26 + $0x80] sm:$0xff] %v826_v27  ;;  %v828_v31 = vadd.f32 %v827_v48, %v571_v28  ;;  %v575_v32 = vadd.f32 %v574_v29, %v1684_v17 }
 0x165   : > { %v576_v33 = vpop.f32.mrf.mxu0  ;;  %v873_v46 = vpop.f32.mrf.mxu1 }
 0x166   : > { %985 = vst [vmem:[%s1691_s26 + $0x88] sm:$0xff] %v828_v31  ;;  %v832_v35 = vadd.f32 %v831_v52, %v575_v32  ;;  %v577_v36 = vadd.f32 %v576_v33, %v1687_v19 }
 0x167   : > { %v580_v37 = vpop.f32.mrf.mxu0  ;;  %v875_v50 = vpop.f32.mrf.mxu1 }
 0x168   : > { %986 = vst [vmem:[%s1691_s26 + $0x90] sm:$0xff] %v832_v35  ;;  %v834_v39 = vadd.f32 %v833_v56, %v577_v36  ;;  %v581_v40 = vadd.f32 %v580_v37, %v1684_v17 }
 0x169   : > { %v582_v41 = vpop.f32.mrf.mxu0  ;;  %v879_v54 = vpop.f32.mrf.mxu1 }
 0x16a   : > { %987 = vst [vmem:[%s1691_s26 + $0x98] sm:$0xff] %v834_v39  ;;  %v838_v43 = vadd.f32 %v837_v60, %v581_v40  ;;  %v583_v44 = vadd.f32 %v582_v41, %v1687_v19 }
 0x16b   : > { %v586_v45 = vpop.f32.mrf.mxu0  ;;  %v881_v58 = vpop.f32.mrf.mxu1 }
 0x16c   : > { %988 = vst [vmem:[%s1691_s26 + $0xa0] sm:$0xff] %v838_v43  ;;  %v840_v47 = vadd.f32 %v839_v0, %v583_v44  ;;  %v587_v48 = vadd.f32 %v586_v45, %v1684_v17 }
 0x16d   : > { %v588_v49 = vpop.f32.mrf.mxu0  ;;  %v885_v62 = vpop.f32.mrf.mxu1 }
 0x16e   : > { %989 = vst [vmem:[%s1691_s26 + $0xa8] sm:$0xff] %v840_v47  ;;  %v844_v51 = vadd.f32 %v843_v4, %v587_v48  ;;  %v589_v52 = vadd.f32 %v588_v49, %v1687_v19 }
 0x16f   : > { %v592_v53 = vpop.f32.mrf.mxu0  ;;  %v887_v2 = vpop.f32.mrf.mxu1 }
 0x170   : > { %990 = vst [vmem:[%s1691_s26 + $0xb0] sm:$0xff] %v844_v51  ;;  %v846_v55 = vadd.f32 %v845_v8, %v589_v52  ;;  %v593_v56 = vadd.f32 %v592_v53, %v1684_v17 }
 0x171   : > { %v594_v57 = vpop.f32.mrf.mxu0  ;;  %v891_v6 = vpop.f32.mrf.mxu1 }
 0x172   : > { %991 = vst [vmem:[%s1691_s26 + $0xb8] sm:$0xff] %v846_v55  ;;  %v850_v59 = vadd.f32 %v849_v12, %v593_v56  ;;  %v595_v60 = vadd.f32 %v594_v57, %v1687_v19 }
 0x173   : > { %v598_v61 = vpop.f32.mrf.mxu0  ;;  %v893_v10 = vpop.f32.mrf.mxu1 }
 0x174   : > { %992 = vst [vmem:[%s1691_s26 + $0xc0] sm:$0xff] %v850_v59  ;;  %v852_v63 = vadd.f32 %v851_v16, %v595_v60  ;;  %v599_v0 = vadd.f32 %v598_v61, %v1684_v17 }
 0x175   : > { %v600_v1 = vpop.f32.mrf.mxu0  ;;  %v897_v14 = vpop.f32.mrf.mxu1 }
 0x176   : > { %993 = vst [vmem:[%s1691_s26 + $0xc8] sm:$0xff] %v852_v63  ;;  %v856_v3 = vadd.f32 %v855_v22, %v599_v0  ;;  %v601_v4 = vadd.f32 %v600_v1, %v1687_v19 }
 0x177   : > { %v604_v5 = vpop.f32.mrf.mxu0  ;;  %v899_v20 = vpop.f32.mrf.mxu1 }
 0x178   : > { %994 = vst [vmem:[%s1691_s26 + $0xd0] sm:$0xff] %v856_v3  ;;  %v858_v7 = vadd.f32 %v857_v26, %v601_v4  ;;  %v605_v8 = vadd.f32 %v604_v5, %v1684_v17 }
 0x179   : > { %v606_v9 = vpop.f32.mrf.mxu0  ;;  %v903_v24 = vpop.f32.mrf.mxu1 }
 0x17a   : > { %995 = vst [vmem:[%s1691_s26 + $0xd8] sm:$0xff] %v858_v7  ;;  %v862_v11 = vadd.f32 %v861_v30, %v605_v8  ;;  %v607_v12 = vadd.f32 %v606_v9, %v1687_v19 }
 0x17b   : > { %v610_v13 = vpop.f32.mrf.mxu0  ;;  %v905_v28 = vpop.f32.mrf.mxu1 }
 0x17c   : > { %996 = vst [vmem:[%s1691_s26 + $0xe0] sm:$0xff] %v862_v11  ;;  %v864_v15 = vadd.f32 %v863_v34, %v607_v12  ;;  %v611_v16 = vadd.f32 %v610_v13, %v1684_v17 }
 0x17d   : > { %v612_v18 = vpop.f32.mrf.mxu0  ;;  %v909_v32 = vpop.f32.mrf.mxu1 }
 0x17e   : > { %997 = vst [vmem:[%s1691_s26 + $0xe8] sm:$0xff] %v864_v15  ;;  %v868_v21 = vadd.f32 %v867_v38, %v611_v16  ;;  %v613_v22 = vadd.f32 %v612_v18, %v1687_v19 }
 0x17f   : > { %v616_v23 = vpop.f32.mrf.mxu0  ;;  %v911_v36 = vpop.f32.mrf.mxu1 }
 0x180   : > { %998 = vst [vmem:[%s1691_s26 + $0xf0] sm:$0xff] %v868_v21  ;;  %v870_v25 = vadd.f32 %v869_v42, %v613_v22  ;;  %v617_v26 = vadd.f32 %v616_v23, %v1684_v17 }
 0x181   : > { %v618_v27 = vpop.f32.mrf.mxu0  ;;  %v915_v40 = vpop.f32.mrf.mxu1 }
 0x182   : > { %999 = vst [vmem:[%s1691_s26 + $0xf8] sm:$0xff] %v870_v25  ;;  %v874_v29 = vadd.f32 %v873_v46, %v617_v26  ;;  %v619_v30 = vadd.f32 %v618_v27, %v1687_v19 }
 0x183   : > { %v622_v31 = vpop.f32.mrf.mxu0  ;;  %v917_v44 = vpop.f32.mrf.mxu1 }
 0x184   : > { %1000 = vst [vmem:[%s1691_s26 + $0x100] sm:$0xff] %v874_v29  ;;  %v876_v33 = vadd.f32 %v875_v50, %v619_v30  ;;  %v623_v34 = vadd.f32 %v622_v31, %v1684_v17 }
 0x185   : > { %v624_v35 = vpop.f32.mrf.mxu0  ;;  %v921_v48 = vpop.f32.mrf.mxu1 }
 0x186   : > { %1001 = vst [vmem:[%s1691_s26 + $0x108] sm:$0xff] %v876_v33  ;;  %v880_v37 = vadd.f32 %v879_v54, %v623_v34  ;;  %v625_v38 = vadd.f32 %v624_v35, %v1687_v19 }
 0x187   : > { %v628_v39 = vpop.f32.mrf.mxu0  ;;  %v923_v52 = vpop.f32.mrf.mxu1 }
 0x188   : > { %1002 = vst [vmem:[%s1691_s26 + $0x110] sm:$0xff] %v880_v37  ;;  %v882_v41 = vadd.f32 %v881_v58, %v625_v38  ;;  %v629_v42 = vadd.f32 %v628_v39, %v1684_v17 }
 0x189   : > { %v630_v43 = vpop.f32.mrf.mxu0  ;;  %v927_v56 = vpop.f32.mrf.mxu1 }
 0x18a   : > { %1003 = vst [vmem:[%s1691_s26 + $0x118] sm:$0xff] %v882_v41  ;;  %v886_v45 = vadd.f32 %v885_v62, %v629_v42  ;;  %v631_v46 = vadd.f32 %v630_v43, %v1687_v19 }
 0x18b   : > { %v634_v47 = vpop.f32.mrf.mxu0  ;;  %v929_v60 = vpop.f32.mrf.mxu1 }
 0x18c   : > { %1004 = vst [vmem:[%s1691_s26 + $0x120] sm:$0xff] %v886_v45  ;;  %v888_v49 = vadd.f32 %v887_v2, %v631_v46  ;;  %v635_v50 = vadd.f32 %v634_v47, %v1684_v17 }
 0x18d   : > { %v636_v51 = vpop.f32.mrf.mxu0  ;;  %v933_v0 = vpop.f32.mrf.mxu1 }
 0x18e   : > { %1005 = vst [vmem:[%s1691_s26 + $0x128] sm:$0xff] %v888_v49  ;;  %v892_v53 = vadd.f32 %v891_v6, %v635_v50  ;;  %v637_v54 = vadd.f32 %v636_v51, %v1687_v19 }
 0x18f   : > { %v640_v55 = vpop.f32.mrf.mxu0  ;;  %v935_v7 = vpop.f32.mrf.mxu1 }
 0x190   : > { %1006 = vst [vmem:[%s1691_s26 + $0x130] sm:$0xff] %v892_v53  ;;  %v894_v57 = vadd.f32 %v893_v10, %v637_v54  ;;  %v641_v58 = vadd.f32 %v640_v55, %v1684_v17 }
 0x191   : > { %v642_v59 = vpop.f32.mrf.mxu0 }
 0x192   : > { %1007 = vst [vmem:[%s1691_s26 + $0x138] sm:$0xff] %v894_v57  ;;  %v898_v61 = vadd.f32 %v897_v14, %v641_v58  ;;  %v643_v62 = vadd.f32 %v642_v59, %v1687_v19  ;;  %v939_v14 = vpop.f32.mrf.mxu1 }
 0x193   : > { %v646_v63 = vpop.f32.mrf.mxu0 }
 0x194   : > { %1008 = vst [vmem:[%s1691_s26 + $0x140] sm:$0xff] %v898_v61  ;;  %v900_v1 = vadd.f32 %v899_v20, %v643_v62  ;;  %v647_v2 = vadd.f32 %v646_v63, %v1684_v17  ;;  %v941_v23 = vpop.f32.mrf.mxu1 }
 0x195   : > { %v648_v3 = vpop.f32.mrf.mxu0 }
 0x196   : > { %1009 = vst [vmem:[%s1691_s26 + $0x148] sm:$0xff] %v900_v1  ;;  %v904_v4 = vadd.f32 %v903_v24, %v647_v2  ;;  %v649_v5 = vadd.f32 %v648_v3, %v1687_v19  ;;  %v945_v30 = vpop.f32.mrf.mxu1 }
 0x197   : > { %v652_v6 = vpop.f32.mrf.mxu0 }
 0x198   : > { %1010 = vst [vmem:[%s1691_s26 + $0x150] sm:$0xff] %v904_v4  ;;  %v906_v8 = vadd.f32 %v905_v28, %v649_v5  ;;  %v653_v9 = vadd.f32 %v652_v6, %v1684_v17  ;;  %v947_v37 = vpop.f32.mrf.mxu1 }
 0x199   : > { %v654_v10 = vpop.f32.mrf.mxu0 }
 0x19a   : > { %1011 = vst [vmem:[%s1691_s26 + $0x158] sm:$0xff] %v906_v8  ;;  %v910_v11 = vadd.f32 %v909_v32, %v653_v9  ;;  %v655_v12 = vadd.f32 %v654_v10, %v1687_v19 }
 0x19b   : > { %v658_v13 = vpop.f32.mrf.mxu0 }
 0x19c   : > { %1012 = vst [vmem:[%s1691_s26 + $0x160] sm:$0xff] %v910_v11  ;;  %v912_v15 = vadd.f32 %v911_v36, %v655_v12  ;;  %v659_v16 = vadd.f32 %v658_v13, %v1684_v17 }
 0x19d   : > { %v660_v18 = vpop.f32.mrf.mxu0 }
 0x19e   : > { %1013 = vst [vmem:[%s1691_s26 + $0x168] sm:$0xff] %v912_v15  ;;  %v916_v20 = vadd.f32 %v915_v40, %v659_v16  ;;  %v661_v21 = vadd.f32 %v660_v18, %v1687_v19 }
 0x19f   : > { %v664_v22 = vpop.f32.mrf.mxu0 }
 0x1a0   : > { %1014 = vst [vmem:[%s1691_s26 + $0x170] sm:$0xff] %v916_v20  ;;  %v918_v24 = vadd.f32 %v917_v44, %v661_v21  ;;  %v665_v25 = vadd.f32 %v664_v22, %v1684_v17  ;;  %v951_v44 = vpop.f32.mrf.mxu1 }
 0x1a1   : > { %v666_v26 = vpop.f32.mrf.mxu0 }
 0x1a2   : > { %1015 = vst [vmem:[%s1691_s26 + $0x178] sm:$0xff] %v918_v24  ;;  %v922_v27 = vadd.f32 %v921_v48, %v665_v25  ;;  %v667_v28 = vadd.f32 %v666_v26, %v1687_v19  ;;  %v953_v51 = vpop.f32.mrf.mxu1 }
 0x1a3   : > { %v670_v29 = vpop.f32.mrf.mxu0 }
 0x1a4   : > { %1016 = vst [vmem:[%s1691_s26 + $0x180] sm:$0xff] %v922_v27  ;;  %v924_v31 = vadd.f32 %v923_v52, %v667_v28  ;;  %v671_v32 = vadd.f32 %v670_v29, %v1684_v17  ;;  %v957_v58 = vpop.f32.mrf.mxu1 }
 0x1a5   : > { %v672_v33 = vpop.f32.mrf.mxu0 }
 0x1a6   : > { %1017 = vst [vmem:[%s1691_s26 + $0x188] sm:$0xff] %v924_v31  ;;  %v928_v34 = vadd.f32 %v927_v56, %v671_v32  ;;  %v673_v35 = vadd.f32 %v672_v33, %v1687_v19  ;;  %v959_v1 = vpop.f32.mrf.mxu1 }
 0x1a7   : > { %v676_v36 = vpop.f32.mrf.mxu0 }
 0x1a8   : > { %1018 = vst [vmem:[%s1691_s26 + $0x190] sm:$0xff] %v928_v34  ;;  %v930_v38 = vadd.f32 %v929_v60, %v673_v35  ;;  %v677_v39 = vadd.f32 %v676_v36, %v1684_v17  ;;  %v963_v8 = vpop.f32.mrf.mxu1 }
 0x1a9   : > { %v678_v40 = vpop.f32.mrf.mxu0 }
 0x1aa   : > { %1019 = vst [vmem:[%s1691_s26 + $0x198] sm:$0xff] %v930_v38  ;;  %v934_v41 = vadd.f32 %v933_v0, %v677_v39  ;;  %v679_v42 = vadd.f32 %v678_v40, %v1687_v19 }
 0x1ab   : > { %v682_v43 = vpop.f32.mrf.mxu0 }
 0x1ac   : > { %1020 = vst [vmem:[%s1691_s26 + $0x1a0] sm:$0xff] %v934_v41  ;;  %v936_v45 = vadd.f32 %v935_v7, %v679_v42  ;;  %v683_v46 = vadd.f32 %v682_v43, %v1684_v17 }
 0x1ad   : > { %v684_v47 = vpop.f32.mrf.mxu0 }
 0x1ae   : > { %1021 = vst [vmem:[%s1691_s26 + $0x1a8] sm:$0xff] %v936_v45  ;;  %v940_v48 = vadd.f32 %v939_v14, %v683_v46  ;;  %v685_v49 = vadd.f32 %v684_v47, %v1687_v19  ;;  %v965_v14 = vpop.f32.mrf.mxu1 }
 0x1af   : > { %v688_v50 = vpop.f32.mrf.mxu0 }
 0x1b0   : > { %1022 = vst [vmem:[%s1691_s26 + $0x1b0] sm:$0xff] %v940_v48  ;;  %v942_v52 = vadd.f32 %v941_v23, %v685_v49  ;;  %v689_v53 = vadd.f32 %v688_v50, %v1684_v17 }
 0x1b1   : > { %v690_v54 = vpop.f32.mrf.mxu0 }
 0x1b2   : > { %1023 = vst [vmem:[%s1691_s26 + $0x1b8] sm:$0xff] %v942_v52  ;;  %v946_v55 = vadd.f32 %v945_v30, %v689_v53  ;;  %v691_v56 = vadd.f32 %v690_v54, %v1687_v19 }
 0x1b3   : > { %v694_v57 = vpop.f32.mrf.mxu0 }
 0x1b4   : > { %1024 = vst [vmem:[%s1691_s26 + $0x1c0] sm:$0xff] %v946_v55  ;;  %v948_v59 = vadd.f32 %v947_v37, %v691_v56  ;;  %v695_v60 = vadd.f32 %v694_v57, %v1684_v17 }
 0x1b5   : > { %v696_v61 = vpop.f32.mrf.mxu0 }
 0x1b6   : > { %1025 = vst [vmem:[%s1691_s26 + $0x1c8] sm:$0xff] %v948_v59  ;;  %v952_v62 = vadd.f32 %v951_v44, %v695_v60  ;;  %v697_v63 = vadd.f32 %v696_v61, %v1687_v19 }
 0x1b7   : > { %v700_v0 = vpop.f32.mrf.mxu0 }
 0x1b8   : > { %1026 = vst [vmem:[%s1691_s26 + $0x1d0] sm:$0xff] %v952_v62  ;;  %v954_v2 = vadd.f32 %v953_v51, %v697_v63  ;;  %v701_v3 = vadd.f32 %v700_v0, %v1684_v17 }
 0x1b9   : > { %v702_v4 = vpop.f32.mrf.mxu0 }
 0x1ba   : > { %1027 = vst [vmem:[%s1691_s26 + $0x1d8] sm:$0xff] %v954_v2  ;;  %v958_v5 = vadd.f32 %v957_v58, %v701_v3  ;;  %v703_v6 = vadd.f32 %v702_v4, %v1687_v19 }
 0x1bb   : > { %v706_v7 = vpop.f32.mrf.mxu0 }
 0x1bc   : > { %1028 = vst [vmem:[%s1691_s26 + $0x1e0] sm:$0xff] %v958_v5  ;;  %v960_v9 = vadd.f32 %v959_v1, %v703_v6  ;;  %v707_v10 = vadd.f32 %v706_v7, %v1684_v17 }
 0x1bd   : > { %v708_v11 = vpop.f32.mrf.mxu0 }
 0x1be   : > { %1029 = vst [vmem:[%s1691_s26 + $0x1e8] sm:$0xff] %v960_v9  ;;  %v964_v12 = vadd.f32 %v963_v8, %v707_v10  ;;  %v709_v13 = vadd.f32 %v708_v11, %v1687_v19 }
 0x1c0   : > { %1030 = vst [vmem:[%s1691_s26 + $0x1f0] sm:$0xff] %v964_v12  ;;  %v966_v17 = vadd.f32 %v965_v14, %v709_v13 }
 0x1c2   : > { %1031 = vst [vmem:[%s1691_s26 + $0x1f8] sm:$0xff] %v966_v17 }
 0x1c3   : > { %1327 = shalt.err (!%p1324_p6)
}
 0x1c4   : > { %s1328_s25 = scalar_lea.hbm %s1822_s6, 8192  ;;  %s1332_s20 = scalar_lea.hbm %s1877_s3, 16384 }
 0x1c5   : > { %p1329_p4 = scmp.ne.s32.totalorder %s1822_s6, %s1328_s25  ;;  %p1333_p0 = scmp.lt.s32.totalorder %s1822_s6, %s1877_s3 }
 0x1c6   : > { %p1334_p3 = scmp.lt.s32.totalorder %s1332_s20, %s1328_s25 }
 0x1c7   : > { %p1330_p9 = pnand %p1329_p4, %p1513_p13 }
 0x1c8   : > { %p1335_p1 = por %p1334_p3, %p1333_p0 }
 0x1c9   : > { %p1331_p12 = pneg %p1330_p9 }
 0x1cb   : > { %p1336_p8 = pnand %p1335_p1, %p1331_p12 }
 0x1cd   : > { %1339 = shalt.err (!%p1336_p8)
}
 0x1ce   : > { %s1408_s26 = smov 256   ;;  %s1409_s27 = smov 16  }
 0x1cf   : > { %1186 = dma.vmem_to_hbm [thread:$0]  (%p1513_p13), %s1824_s30, 8192, %s1822_s6, %s1033_s15, %s1408_s26, %s1408_s26, %s1409_s27  }
 0x1d0 PF: > { %s1064_s4 = sand.u32 1, %s1378_s12   ;;  %p1888_p11 = scmp.ne.s32.totalorder %s1882_s23, 0 }
 0x1d1   : > { %s1065_s5 = scalar_lea.sflag [#allocation4], %s1064_s4 }
 0x1d2   : > { %p1197_p2 = pnand %p1162_p10, %p1888_p11 }
 0x1d4   : > { %p1198_p5 = pneg %p1197_p2 }
 0x1d6   : > { %1373 = dma.done.wait (%p1198_p5), %s1065_s5, 8192  }
 0x1d7   : > { %1375 = vsyncadd (%p1198_p5), %s1065_s5, 4294959104  ;;  %s20_s17 = sadd.s32 1, %s1398_s17   ;;  %s1889_s12 = smov %s1382_s13 }
 0x1d8   : > { %p17_p7 = scmp.ge.s32.totalorder %s20_s17, 4   ;;  %s1890_s13 = smov %s1386_s14 }
 0x1d9   : > { %s1891_s14 = smov %s1522_s18  ;;  %s1892_s15 = smov %s1394_s16 }
 0x1da   : > { %s1893_s16 = smov %s1895_s28  ;;  %19 = sbr.rel (!%p17_p7) target bundleno = 7 (0x7), region = 85 }
 0x1df   :  { %1070 = vsyncpa [#allocation3], 1 }
 0x1e0   :  { %1072 = vsyncpa [#allocation3 + $0x1], 1 }
 0x1e1   :  { %1073 = vsyncpa [#allocation6], 1 }
 0x1e2   :  { %1074 = vsyncpa [#allocation4], 1 }
 0x1e3   :  { %1076 = vsyncpa [#allocation4 + $0x1], 1 }

</bundles_post_ra>
